<compile_context>
chip_gen: v5e
topology: v5e:2x2
jax: 0.10.0
libtpu: 0.0.40
codegen_flags: <defaults>
</compile_context>

<pallas_src>
import jax
import jax.numpy as jnp
from jax.experimental import pallas as pl
from jax.experimental.pallas import tpu as pltpu

_LANE_WIDTH = 512                    # lane-dense repack width (multiple of 128)
_SUBLANES = 8                        # sublane granule
_GRANULE = _SUBLANES * _LANE_WIDTH   # 4096 elements: min pad granule / fallback threshold
_DEFAULT_BLOCK_ROWS = 1024           # 1024 x 512 f32 = 2 MiB per block


def _scale_shift_kernel(w_ref, b_ref, x_ref, o_ref):
    """y = x * w + b (the 1->1 nn.Linear), pure VPU, scalars from SMEM, f32 math."""
    w = w_ref[0]          # SMEM scalar (weight[0, 0])
    b = b_ref[0]          # SMEM scalar (bias[0, 0])
    y = x_ref[...].astype(jnp.float32) * w + b
    o_ref[...] = y.astype(o_ref.dtype)


def linear_block(x, weight, bias, *, block_rows=_DEFAULT_BLOCK_ROWS,
                 min_pallas_elems=_GRANULE):
    """Pallas call for the dummy LinearBlock(1, 1).

    x:      (B, 1)  (torch.nn.Linear convention, in_features = 1)
    weight: (1, 1) float32   (out_features, in_features)
    bias:   (1, 1) float32
    returns (B, 1) in x.dtype
    """
    B, in_f = x.shape
    out_f = weight.shape[0]
    assert in_f == 1 and out_f == 1, "dummy LinearBlock is 1 -> 1"

    w = weight.reshape(()).astype(jnp.float32)
    b = bias.reshape(()).astype(jnp.float32)

    # Small / degenerate batch (incl. B == 0): pallas launch + repack dwarfs the work;
    # XLA fuses this into a single scale-and-shift.
    if B < min_pallas_elems:
        return (x.astype(jnp.float32) * w + b).astype(x.dtype)

    # ---- lane-dense repack: (B, 1) -> (rows, 512), rows a multiple of 8 sublanes ----
    rows = -(-B // _LANE_WIDTH)                  # ceil(B / 512)
    rows = -(-rows // _SUBLANES) * _SUBLANES     # round up to sublane granule
    padded = rows * _LANE_WIDTH

    x_flat = x.reshape(-1)
    need_pad = padded != B
    if need_pad:
        x_flat = jnp.pad(x_flat, (0, padded - B))  # only pad to the 8x512 granule
    x2d = x_flat.reshape(rows, _LANE_WIDTH)

    # Row-block size: <= block_rows, multiple of 8; guarantee >= 2 grid steps when
    # there are enough rows so both v7x TensorCores get work.
    tr = min(block_rows, rows)
    if rows >= 2 * _SUBLANES and pl.cdiv(rows, tr) < 2:
        tr = -(-(rows // 2) // _SUBLANES) * _SUBLANES
    grid = (pl.cdiv(rows, tr),)                  # ragged last block handled by Pallas

    # scalars -> flat 1-D for minimal SMEM padding
    w_s = w.reshape(1)
    b_s = b.reshape(1)

    y2d = pl.pallas_call(
        _scale_shift_kernel,
        out_shape=jax.ShapeDtypeStruct((rows, _LANE_WIDTH), x.dtype),
        grid=grid,
        in_specs=[
            # scalar params ride the scalar path (SMEM), no per-step VMEM DMA
            pl.BlockSpec(memory_space=pltpu.MemorySpace.SMEM),
            pl.BlockSpec(memory_space=pltpu.MemorySpace.SMEM),
            # lane-dense data tiles, 1-D grid over row blocks
            pl.BlockSpec((tr, _LANE_WIDTH), lambda i: (i, 0)),
        ],
        out_specs=pl.BlockSpec((tr, _LANE_WIDTH), lambda i: (i, 0)),
        compiler_params=pltpu.CompilerParams(
            dimension_semantics=("parallel",),
        ),
    )(w_s, b_s, x2d)

    y_flat = y2d.reshape(-1)
    if need_pad:
        y_flat = y_flat[:B]                      # drop granule padding only when present
    return y_flat.reshape(B, out_f)


class PallasDummyDiscriminator:
    """JAX/Pallas mirror of imaginaire.discriminators.dummy.Discriminator."""

    def __init__(self, dis_cfg=None, data_cfg=None, key=None):
        if key is None:
            key = jax.random.PRNGKey(0)
        kw, kb = jax.random.split(key)
        # LinearBlock(1, 1): weight (1, 1), bias (1, 1). Deterministic synthetic init
        # (uniform in +-1/sqrt(in_features) = +-1, matching nn.Linear's default range).
        self.dummy_weight = jax.random.uniform(kw, (1, 1), jnp.float32, -1.0, 1.0)
        self.dummy_bias = jax.random.uniform(kb, (1, 1), jnp.float32, -1.0, 1.0)

    def dummy_layer(self, x):
        """The (unused-in-forward) LinearBlock(1, 1), run through the Pallas kernel."""
        return linear_block(x, self.dummy_weight, self.dummy_bias)

    def forward(self, data):
        """Dummy discriminator forward.

        Args:
            data (dict):
        Returns:
            None (exactly like the PyTorch module). No kernel launch in the hot path.
        """
        return None

    __call__ = forward


if __name__ == "__main__":
    key = jax.random.PRNGKey(0)
    k_img, k1, k2, k3 = jax.random.split(key, 4)

    disc = PallasDummyDiscriminator(dis_cfg=None, data_cfg=None, key=jax.random.PRNGKey(0))

    # Small example "data" dict, consistent with what a discriminator would receive.
    data = {"images": jax.random.normal(k_img, (2, 4, 16, 16), jnp.float32)}

    # Forward pass: returns None, exactly matching the PyTorch module's semantics.
    out = disc(data)
    assert out is None

    def ref(x):
        return (x @ disc.dummy_weight.T + disc.dummy_bias).astype(x.dtype)

    # 1) Pallas path, unaligned B: exercises granule pad + ragged last grid block + 2 blocks.
    x1 = jax.random.normal(k1, (10000, 1), jnp.float32)
    y1 = jax.block_until_ready(disc.dummy_layer(x1))
    assert y1.shape == (10000, 1) and y1.dtype == x1.dtype
    assert jnp.allclose(y1, ref(x1), atol=1e-5), "kernel mismatch (ragged path)"

    # 2) Pallas path, aligned B: no pad / no slice, >=2 grid blocks (v7x megacore).
    x2 = jax.random.normal(k2, (16384, 1), jnp.float32)
    y2 = jax.block_until_ready(disc.dummy_layer(x2))
    assert jnp.allclose(y2, ref(x2), atol=1e-5), "kernel mismatch (aligned path)"

    # 3) Small-batch fallback: plain fused JAX, no kernel launch.
    x3 = jax.random.normal(k3, (8, 1), jnp.float32)
    y3 = jax.block_until_ready(disc.dummy_layer(x3))
    assert jnp.allclose(y3, ref(x3), atol=1e-5), "fallback mismatch"

    print("KERNEL_OK")
</pallas_src>

<mosaic_0001>
module attributes {stable_mosaic.version = 11 : i64} {
  func.func @_scale_shift_kernel(%arg0: i32, %arg1: memref<1xf32, #tpu.memory_space<smem>>, %arg2: memref<1xf32, #tpu.memory_space<smem>>, %arg3: memref<16x512xf32, #tpu.memory_space<vmem>>, %arg4: memref<16x512xf32, #tpu.memory_space<vmem>>) attributes {dimension_semantics = [#tpu.dimension_semantics<parallel>], iteration_bounds = array<i64: 2>, scalar_prefetch = 0 : i64, scratch_operands = 0 : i64, tpu.core_type = #tpu.core_type<tc>, window_params = [{transform_indices = @transform_0, window_bounds = array<i64: 1>}, {transform_indices = @transform_1, window_bounds = array<i64: 1>}, {transform_indices = @transform_2, window_bounds = array<i64: 16, 512>}, {transform_indices = @transform_3, window_bounds = array<i64: 16, 512>}]} {
    %c0 = arith.constant 0 : index
    %0 = memref.load %arg1[%c0] : memref<1xf32, #tpu.memory_space<smem>>
    %c0_0 = arith.constant 0 : index
    %1 = memref.load %arg2[%c0_0] : memref<1xf32, #tpu.memory_space<smem>>
    %c0_1 = arith.constant 0 : index
    %c0_2 = arith.constant 0 : index
    %2 = vector.load %arg3[%c0_1, %c0_2] : memref<16x512xf32, #tpu.memory_space<vmem>>, vector<16x512xf32>
    %3 = vector.broadcast %0 : f32 to vector<16x512xf32>
    %4 = arith.mulf %2, %3 : vector<16x512xf32>
    %5 = vector.broadcast %1 : f32 to vector<16x512xf32>
    %6 = arith.addf %4, %5 : vector<16x512xf32>
    %c0_3 = arith.constant 0 : index
    %c0_4 = arith.constant 0 : index
    %7 = vector.load %arg4[%c0_3, %c0_4] : memref<16x512xf32, #tpu.memory_space<vmem>>, vector<16x512xf32>
    tpu.vector_store %arg4[%c0_3, %c0_4], %6 {strides = array<i32>} : memref<16x512xf32, #tpu.memory_space<vmem>>, vector<16x512xf32>,
    return
  }
  func.func @transform_0(%arg0: i32) -> i32 {
    %c0_i32 = arith.constant 0 : i32
    %c0_i32_0 = arith.constant 0 : i32
    return %c0_i32 : i32
  }
  func.func @transform_1(%arg0: i32) -> i32 {
    %c0_i32 = arith.constant 0 : i32
    %c0_i32_0 = arith.constant 0 : i32
    return %c0_i32 : i32
  }
  func.func @transform_2(%arg0: i32) -> (i32, i32) {
    %c0_i32 = arith.constant 0 : i32
    %c0_i32_0 = arith.constant 0 : i32
    return %arg0, %c0_i32 : i32, i32
  }
  func.func @transform_3(%arg0: i32) -> (i32, i32) {
    %c0_i32 = arith.constant 0 : i32
    %c0_i32_0 = arith.constant 0 : i32
    return %arg0, %c0_i32 : i32, i32
  }
}

</mosaic_0001>

<bundles_post_ra>
// kernel: tpu_custom_call.1
= control target key start
LH: loop header
LB: loop body
LE: loop exit
PB: predicated region body
PF: predicated region fallthrough
CT: control target
= control target key end

     0   :  { %s746_s0 = inlined_call_operand.<no memory space> [shape: f32[1], index: 0, kind: input, shape index: {}]   ;;  %s747_s1 = inlined_call_operand.<no memory space> [shape: f32[1], index: 1, kind: input, shape index: {}]   ;;  %s748_s2 = inlined_call_operand.hbm [shape: f32[24,512], index: 2, kind: input, shape index: {}]   ;;  %s749_s3 = inlined_call_operand.hbm [shape: f32[24,512], index: 3, kind: output, shape index: {}]  }
   0x1   :  { %8 = sst [smem:[#allocation2]] %s746_s0 }
   0x2   :  { %9 = sst [smem:[#allocation3]] %s747_s1 }
   0x3   :  { %10 = vsyncpa [#allocation5], 0 }
   0x4   :  { %12 = vsyncpa [#allocation5 + $0x1], 0 }
   0x5   :  { %13 = vsyncpa [#allocation6], 0 }
   0x6   :  { %15 = vsyncpa [#allocation6 + $0x1], 0  ;;  %s573_s16 = smov 0   ;;  %s575_s17 = smov 0  }
   0x7   :  { %s577_s18 = smov 0   ;;  %s579_s19 = smov 0  }
   0x8 LB: > { %s594_s0 = sadd.s32 4294967295, %s539_s19   ;;  %s348_s1 = sadd.s32 4294967294, %s539_s19   ;;  %s539_s19 = sphi %s579_s19, %s760_s19   ;;  %s535_s18 = sphi %s577_s18, %s759_s18   ;;  %s531_s17 = sphi %s575_s17, %s758_s17   ;;  %s527_s16 = sphi %s573_s16, %s757_s16  }
   0x9   : > { %s598_s20 = sadd.s32 1, %s539_s19   ;;  %s70_s21 = sadd.s32 1, %s535_s18 }
   0xa   : > { %s67_s22 = ssub.s32 %s539_s19, %s598_s20  ;;  %p77_p0 = scmp.ne.s32.totalorder %s535_s18, %s531_s17 }
   0xb   : > { %p68_p1 = scmp.eq.s32.totalorder %s67_s22, 0  ;;  %p78_p2 = scmp.eq.s32.totalorder %s539_s19, 0 }
   0xc   : > { %p83_p3 = scmp.ne.s32.totalorder %s531_s17, %s527_s16  ;;  %p84_p4 = scmp.eq.s32.totalorder %s594_s0, 0 }
   0xd   : > { %s610_s23 = scalar_select %p68_p1, %s535_s18, %s70_s21  }
   0xe   : > { %p79_p5 = por %p78_p2, %p77_p0  ;;  %p612_p6 = por %p84_p4, %p83_p3 }
   0xf   : > { %p107_p7 = scmp.eq.s32.totalorder %s594_s0, 1  ;;  %p113_p8 = scmp.eq.s32.totalorder %s348_s1, 1 }
  0x10   : > { %p750_p11 = scmp.ge.s32.totalorder %s539_s19, 2 }
  0x11   : > { %p617_p9 = por %p107_p7, %p77_p0  ;;  %p621_p10 = por %p113_p8, %p83_p3 }
  0x12   : > { %135 = sbr.rel (%p750_p11) target bundleno = 59 (0x3b), region = 24 }
  0x17   : > { %138 = sbr.rel (!%p79_p5) target bundleno = 59 (0x3b), region = 28  ;;  %s139_s27 = sand.u32 (%p79_p5), 1, %s535_s18  }
  0x18   : > { %s352_s28 = sshll.u32 (%p79_p5), %s539_s19, 1  ;;  %s351_s29 = sshll.u32 (%p79_p5), %s139_s27, 6 }
  0x19   : > { %s145_s30 = ssub.s32 (%p79_p5), 3, %s352_s28  ;;  %s633_s7 = scalar_lea.sflag (%p79_p5), [#allocation5], %s139_s27 }
  0x1a   : > { %p146_p12 = scmp.lt.s32.totalorder (%p79_p5), %s145_s30, 2  ;;  %s143_s8 = scalar_lea.vmem (%p79_p5), [#allocation4], %s351_s29 }
  0x1c   : > { %s762_s30 = smov (!%p146_p12, %s145_s30), 2 }
  0x1d   : > { %s374_s4 = sshll.u32 %s762_s30, 5 }
  0x1e   : > { %s150_s5 = ssub.s32 64, %s374_s4 }
  0x1f   : > { %s151_s6 = sshll.u32 %s150_s5, 4 }
  0x20   : > { %152 = vsyncadd %s633_s7, %s151_s6  ;;  %p636_p13 = scmp.ne.s32.totalorder %s374_s4, 0  ;;  %s376_s10 = sshll.u32 %s539_s19, 6 }
  0x21   : > { %s156_s13 = scalar_lea.hbm %s748_s2, %s376_s10  ;;  %s644_s14 = sshll.u32 %s143_s8, 4  ;;  %s161_s14 = int_to_ptr.vmem [resolvable:$true] %s644_s14 }
  0x22   : > { %s158_s15 = sshll.u32 %s156_s13, 4  ;;  %s359_s1 = sshll.u32 %s762_s30, 9  ;;  %s647_s15 = int_to_ptr.hbm [resolvable:$true] %s158_s15 }
  0x23   : > { %s423_s21 = sshra.s32 %s647_s15, 4  ;;  %s425_s22 = sshrl.u32 %s359_s1, 4  ;;  %s424_s21 = int_to_ptr.hbm [resolvable:$true] %s423_s21 }
  0x24   : > { %s430_s27 = scalar_lea.hbm %s424_s21, %s425_s22  ;;  %s434_s4 = scalar_lea.hbm %s748_s2, 96 }
  0x25   : > { %p431_p0 = scmp.ne.s32.totalorder %s424_s21, %s430_s27  ;;  %p435_p3 = scmp.lt.s32.totalorder %s424_s21, %s748_s2 }
  0x26   : > { %p436_p4 = scmp.lt.s32.totalorder %s434_s4, %s430_s27 }
  0x27   : > { %p432_p1 = pnand %p431_p0, %p636_p13 }
  0x28   : > { %p437_p5 = por %p436_p4, %p435_p3 }
  0x29   : > { %p433_p2 = pneg %p432_p1 }
  0x2b   : > { %p438_p7 = pnand %p437_p5, %p433_p2 }
  0x2d   : > { %441 = shalt.err (!%p438_p7)
}
  0x2e   : > { %s442_s8 = sshra.s32 %s161_s14, 4  ;;  %s541_s11 = smov [#allocation4]   ;;  %s443_s8 = int_to_ptr.vmem [resolvable:$true] %s442_s8 }
  0x2f   : > { %s449_s10 = scalar_lea.vmem %s443_s8, %s425_s22  ;;  %s453_s12 = scalar_lea.vmem %s541_s11, 128 }
  0x30   : > { %p450_p8 = scmp.ne.s32.totalorder %s443_s8, %s449_s10  ;;  %p455_p1 = scmp.lt.s32.totalorder %s453_s12, %s449_s10 }
  0x32   : > { %p451_p12 = pnand %p450_p8, %p636_p13 }
  0x34   : > { %p452_p0 = pneg %p451_p12 }
  0x36   : > { %p457_p11 = pnand %p455_p1, %p452_p0 }
  0x38   : > { %460 = shalt.err (!%p457_p11)
}
  0x39   : > { %s542_s13 = smov 512   ;;  %s543_s21 = smov 32  }
  0x3a   : > { %166 = dma.hbm_to_vmem [thread:$0]  (%p636_p13), %s647_s15, %s359_s1, %s161_s14, %s633_s7, %s542_s13, %s542_s13, %s543_s21  }
  0x3b PF: > { %p360_p2 = scmp.ge.s32.totalorder %s539_s19, 1  ;;  %p168_p3 = scmp.lt.s32.totalorder %s539_s19, 3 }
  0x3d   : > { %p169_p4 = pnand %p360_p2, %p168_p3 }
  0x3e   : > { %s676_s22 = sand.u32 (!%p169_p4), 1, %s531_s17  }
  0x3f   : > { %172 = sbr.rel (%p169_p4) target bundleno = 119 (0x77), region = 32  ;;  %s361_s27 = sshll.u32 (!%p169_p4), %s676_s22, 6 }
  0x40   : > { %s175_s28 = scalar_lea.sflag (!%p169_p4), [#allocation5], %s676_s22  ;;  %s178_s9 = scalar_lea.vmem (!%p169_p4), [#allocation4], %s361_s27 }
  0x44   : > { %518 = dma.done.wait (%p612_p6), %s175_s28, 1024  }
  0x45   : > { %520 = vsyncadd (%p612_p6), %s175_s28, 4294966272  ;;  %s214_s30 = sld [smem:[#allocation2]]  ;;  %v216_v0 = vld [vmem:[%s178_s9] sm:$0xff]  ;;  %v217_v2 = vld [vmem:[%s178_s9 + $0x8] sm:$0xff]  ;;  %s201_s24 = scalar_lea.vmem [#allocation7], %s361_s27 }
  0x46   : > { %s215_s7 = sld [smem:[#allocation3]]  ;;  %v218_v3 = vld [vmem:[%s178_s9 + $0x10] sm:$0xff]  ;;  %v219_v8 = vld [vmem:[%s178_s9 + $0x18] sm:$0xff]  ;;  %v220_v9 = vld [vmem:[%s178_s9 + $0x20] sm:$0xff]  ;;  %s251_s14 = scalar_lea.sflag [#allocation6], %s676_s22 }
  0x47   : > { %v221_v10 = vld [vmem:[%s178_s9 + $0x28] sm:$0xff]  ;;  %v222_v14 = vld [vmem:[%s178_s9 + $0x30] sm:$0xff]  ;;  %v223_v15 = vld [vmem:[%s178_s9 + $0x38] sm:$0xff]  ;;  %s364_s15 = sshll.u32 (%p617_p9), %s594_s0, 1 }
  0x48   : > { %s259_s1 = ssub.s32 (%p617_p9), 3, %s364_s15 }
  0x49   : > { %p260_p6 = scmp.lt.s32.totalorder (%p617_p9), %s259_s1, 2 }
  0x4b   : > { %v224_v1 = vstv %s214_s30 }
  0x4c   : > { %v225_v4 = vmul.f32 %v224_v1, %v216_v0  ;;  %v233_v5 = vstv %s215_s7  ;;  %v226_v6 = vmul.f32 %v224_v1, %v217_v2  ;;  %v227_v7 = vmul.f32 %v224_v1, %v218_v3 }
  0x4d   : > { %v228_v11 = vmul.f32 %v224_v1, %v219_v8  ;;  %v229_v12 = vmul.f32 %v224_v1, %v220_v9  ;;  %v230_v13 = vmul.f32 %v224_v1, %v221_v10  ;;  %v231_v19 = vmul.f32 %v224_v1, %v222_v14 }
  0x4e   : > { %v234_v16 = vadd.f32 %v233_v5, %v225_v4  ;;  %v235_v17 = vadd.f32 %v233_v5, %v226_v6  ;;  %v236_v18 = vadd.f32 %v233_v5, %v227_v7  ;;  %v232_v21 = vmul.f32 %v224_v1, %v223_v15 }
  0x4f   : > { %v237_v20 = vadd.f32 %v233_v5, %v228_v11  ;;  %v238_v22 = vadd.f32 %v233_v5, %v229_v12  ;;  %v239_v23 = vadd.f32 %v233_v5, %v230_v13  ;;  %v240_v24 = vadd.f32 %v233_v5, %v231_v19 }
  0x50   : > { %242 = vst [vmem:[%s201_s24] sm:$0xff] %v234_v16  ;;  %v241_v25 = vadd.f32 %v233_v5, %v232_v21 }
  0x51   : > { %243 = vst [vmem:[%s201_s24 + $0x8] sm:$0xff] %v235_v17 }
  0x52   : > { %244 = vst [vmem:[%s201_s24 + $0x10] sm:$0xff] %v236_v18 }
  0x53   : > { %245 = vst [vmem:[%s201_s24 + $0x18] sm:$0xff] %v237_v20  ;;  %257 = sbr.rel (!%p617_p9) target bundleno = 119 (0x77), region = 40 }
  0x54   : > { %246 = vst [vmem:[%s201_s24 + $0x20] sm:$0xff] %v238_v22 }
  0x55   : > { %247 = vst [vmem:[%s201_s24 + $0x28] sm:$0xff] %v239_v23 }
  0x56   : > { %248 = vst [vmem:[%s201_s24 + $0x30] sm:$0xff] %v240_v24 }
  0x57   : > { %249 = vst [vmem:[%s201_s24 + $0x38] sm:$0xff] %v241_v25 }
  0x58   : > { %s764_s1 = smov (!%p260_p6, %s259_s1), 2 }
  0x59   : > { %s377_s29 = sshll.u32 %s764_s1, 5 }
  0x5a   : > { %s264_s4 = ssub.s32 64, %s377_s29 }
  0x5b   : > { %s265_s5 = sshll.u32 %s264_s4, 4 }
  0x5c   : > { %266 = vsyncadd %s251_s14, %s265_s5  ;;  %p693_p11 = scmp.ne.s32.totalorder %s377_s29, 0  ;;  %s379_s25 = sshll.u32 %s594_s0, 6 }
  0x5d   : > { %s270_s11 = scalar_lea.hbm %s749_s3, %s379_s25  ;;  %s272_s12 = sshll.u32 %s201_s24, 4  ;;  %s701_s12 = int_to_ptr.vmem [resolvable:$true] %s272_s12 }
  0x5e   : > { %s274_s13 = sshll.u32 %s270_s11, 4  ;;  %s371_s21 = sshll.u32 %s764_s1, 9  ;;  %s703_s13 = int_to_ptr.hbm [resolvable:$true] %s274_s13 }
  0x5f   : > { %s462_s27 = sshra.s32 %s701_s12, 4  ;;  %s464_s28 = sshrl.u32 %s371_s21, 4  ;;  %s463_s27 = int_to_ptr.vmem [resolvable:$true] %s462_s27 }
  0x60   : > { %s469_s9 = scalar_lea.vmem %s463_s27, %s464_s28  ;;  %s544_s0 = smov [#allocation7]  }
  0x61   : > { %p470_p9 = scmp.ne.s32.totalorder %s463_s27, %s469_s9  ;;  %s473_s30 = scalar_lea.vmem %s544_s0, 128 }
  0x62   : > { %p475_p7 = scmp.lt.s32.totalorder %s473_s30, %s469_s9 }
  0x63   : > { %p471_p13 = pnand %p470_p9, %p693_p11 }
  0x65   : > { %p472_p5 = pneg %p471_p13 }
  0x67   : > { %p477_p8 = pnand %p475_p7, %p472_p5 }
  0x69   : > { %480 = shalt.err (!%p477_p8)
}
  0x6a   : > { %s481_s7 = sshra.s32 %s703_s13, 4  ;;  %s492_s4 = scalar_lea.hbm %s749_s3, 96  ;;  %s482_s7 = int_to_ptr.hbm [resolvable:$true] %s481_s7 }
  0x6b   : > { %s488_s24 = scalar_lea.hbm %s482_s7, %s464_s28  ;;  %p493_p2 = scmp.lt.s32.totalorder %s482_s7, %s749_s3 }
  0x6c   : > { %p489_p12 = scmp.ne.s32.totalorder %s482_s7, %s488_s24  ;;  %p494_p3 = scmp.lt.s32.totalorder %s492_s4, %s488_s24 }
  0x6e   : > { %p490_p0 = pnand %p489_p12, %p693_p11  ;;  %p495_p4 = por %p494_p3, %p493_p2 }
  0x70   : > { %p491_p1 = pneg %p490_p0 }
  0x72   : > { %p496_p6 = pnand %p495_p4, %p491_p1 }
  0x74   : > { %499 = shalt.err (!%p496_p6)
}
  0x75   : > { %s545_s8 = smov 512   ;;  %s546_s10 = smov 32  }
  0x76   : > { %280 = dma.vmem_to_hbm [thread:$0]  (%p693_p11), %s701_s12, %s371_s21, %s703_s13, %s251_s14, %s545_s8, %s545_s8, %s546_s10  }
  0x77 PF: > { %s289_s11 = sand.u32 1, %s527_s16   ;;  %p756_p9 = scmp.ge.s32.totalorder %s539_s19, 2 }
  0x78   : > { %s290_s27 = scalar_lea.sflag [#allocation6], %s289_s11 }
  0x79   : > { %p383_p13 = pnand %p756_p9, %p621_p10 }
  0x7b   : > { %p384_p5 = pneg %p383_p13 }
  0x7d   : > { %522 = dma.done.wait (%p384_p5), %s290_s27, 1024  }
  0x7e   : > { %524 = vsyncadd (%p384_p5), %s290_s27, 4294966272  ;;  %p18_p7 = scmp.ge.s32.totalorder %s598_s20, 4   ;;  %s757_s16 = smov %s531_s17 }
  0x7f   : > { %s758_s17 = smov %s535_s18  ;;  %s759_s18 = smov %s610_s23 }
  0x80   : > { %s760_s19 = smov %s598_s20  ;;  %20 = sbr.rel (!%p18_p7) target bundleno = 8 (0x8), region = 77 }
  0x85   :  { %296 = vsyncpa [#allocation5], 1 }
  0x86   :  { %298 = vsyncpa [#allocation5 + $0x1], 1 }
  0x87   :  { %299 = vsyncpa [#allocation6], 1 }
  0x88   :  { %301 = vsyncpa [#allocation6 + $0x1], 1 }

</bundles_post_ra>
